<compile_context>
chip_gen: v6e
topology: v6e:2x2x1
jax: 0.10.0
libtpu: 0.0.40
codegen_flags: <defaults>
</compile_context>

<pallas_src>
import functools

import jax
import jax.numpy as jnp
from jax.experimental import pallas as pl
from jax.experimental.pallas import tpu as pltpu


def _round_up(x, m):
    return ((x + m - 1) // m) * m


def linear_kernel(x_ref, w_ref, b_ref, o_ref, acc_ref):
    """Computes one (TM, TN) output tile, accumulating over the K grid axis."""
    @pl.when(pl.program_id(2) == 0)
    def _init():
        acc_ref[...] = jnp.zeros_like(acc_ref)

    acc_ref[...] += jnp.dot(
        x_ref[...], w_ref[...], preferred_element_type=jnp.float32
    )

    # Bias is added exactly once, on the final K step (then cast + store).
    @pl.when(pl.program_id(2) == pl.num_programs(2) - 1)
    def _finalize():
        o_ref[...] = (
            acc_ref[...] + b_ref[...].astype(jnp.float32)
        ).astype(o_ref.dtype)


@jax.jit
def lr_forward(x, w_t, bias):
    """LR.forward with nn.Linear semantics.

    Args:
      x:    [B, IN]
      w_t:  [IN, OUT]  -- weight pre-transposed once at init (PyTorch stores
                          [OUT, IN]; we keep [IN, OUT] so the kernel is a
                          plain x @ W on the MXU with no per-call transpose).
      bias: [OUT]
    """
    B, IN = x.shape
    IN2, OUT = w_t.shape
    assert IN == IN2 and bias.shape == (OUT,)

    # Tile sizes: lane-dense output (multiple of 128; 256 when wide enough to
    # fill the v6e/v7x 256-wide MXU), K tile up to 512, M tile up to 256.
    # Double-buffered x/w tiles + resident f32 acc stay far under v7x's
    # 32 MiB default scoped VMEM: 2*(256*512 + 512*256)*4 + 256*256*4 ~ 2.3 MiB.
    TM = min(256, _round_up(B, 8))
    TN = min(256, _round_up(OUT, 128))
    TK = min(512, _round_up(IN, 128))

    M = _round_up(B, TM)
    N = _round_up(OUT, TN)
    K = _round_up(IN, TK)

    # Zero-pad to tile multiples (zeros contribute nothing to the matmul;
    # padded rows/cols are sliced off below).
    x_p = x if (M == B and K == IN) else jnp.pad(x, ((0, M - B), (0, K - IN)))
    w_p = w_t if (K == IN and N == OUT) else jnp.pad(
        w_t, ((0, K - IN), (0, N - OUT)))
    b_p = (bias if N == OUT else jnp.pad(bias, (0, N - OUT))).reshape(1, N)

    grid = (M // TM, N // TN, K // TK)
    bytes_el = x.dtype.itemsize

    out_p = pl.pallas_call(
        linear_kernel,
        out_shape=jax.ShapeDtypeStruct((M, N), x.dtype),
        grid_spec=pltpu.PrefetchScalarGridSpec(
            num_scalar_prefetch=0,
            grid=grid,
            in_specs=[
                pl.BlockSpec((TM, TK), lambda i, j, k: (i, k)),
                pl.BlockSpec((TK, TN), lambda i, j, k: (k, j)),
                pl.BlockSpec((1, TN), lambda i, j, k: (0, j)),
            ],
            out_specs=pl.BlockSpec((TM, TN), lambda i, j, k: (i, j)),
            scratch_shapes=[pltpu.VMEM((TM, TN), jnp.float32)],
        ),
        compiler_params=pltpu.CompilerParams(
            dimension_semantics=("parallel", "parallel", "arbitrary"),
        ),
        cost_estimate=pl.CostEstimate(
            flops=2 * M * N * K,
            transcendentals=0,
            bytes_accessed=(M * K + K * N + N + M * N) * bytes_el,
        ),
    )(x_p, w_p, b_p)

    return out_p[:B, :OUT]


def lr_init(key, input_size, output_size, dtype=jnp.float32):
    """Matches PyTorch nn.Linear default init: U(-1/sqrt(in), 1/sqrt(in)).

    Stores the weight pre-transposed as [IN, OUT] so forward never pays for
    a transpose.
    """
    kw, kb = jax.random.split(key)
    bound = 1.0 / (input_size ** 0.5)
    weight = jax.random.uniform(
        kw, (output_size, input_size), dtype, -bound, bound)
    bias = jax.random.uniform(kb, (output_size,), dtype, -bound, bound)
    return {"w_t": jnp.asarray(weight.T), "bias": bias}


if __name__ == "__main__":
    # NOTE: at the toy LR shape (8x32x16) any hand kernel is dominated by
    # launch overhead / vreg padding; a fused XLA dot would be preferable in
    # production. The second case exercises the real multi-tile grid path.
    key = jax.random.PRNGKey(0)

    cases = [
        (8, 32, 16),       # toy shape consistent with LR(32, 16)
        (256, 640, 384),   # multi-tile: 2 N tiles, 2 K tiles (accumulator path)
    ]

    for batch, input_size, output_size in cases:
        key, kp, kd = jax.random.split(key, 3)
        params = lr_init(kp, input_size, output_size)
        x = jax.random.normal(kd, (batch, input_size), jnp.float32)

        out = jax.block_until_ready(
            lr_forward(x, params["w_t"], params["bias"]))

        # Correctness check against plain-JAX nn.Linear reference.
        ref = x @ params["w_t"] + params["bias"]
        assert out.shape == (batch, output_size)
        assert jnp.allclose(out, ref, atol=1e-4, rtol=1e-4), (
            f"mismatch at shape {(batch, input_size, output_size)}")

    print("KERNEL_OK")
</pallas_src>

<mosaic_0001>
module attributes {stable_mosaic.version = 11 : i64} {
  func.func @linear_kernel(%arg0: i32, %arg1: i32, %arg2: i32, %arg3: memref<8x128xf32, #tpu.memory_space<vmem>>, %arg4: memref<128x128xf32, #tpu.memory_space<vmem>>, %arg5: memref<1x128xf32, #tpu.memory_space<vmem>>, %arg6: memref<8x128xf32, #tpu.memory_space<vmem>>, %arg7: memref<8x128xf32, #tpu.memory_space<vmem>>) attributes {dimension_semantics = [#tpu.dimension_semantics<parallel>, #tpu.dimension_semantics<parallel>, #tpu.dimension_semantics<arbitrary>], iteration_bounds = array<i64: 1, 1, 1>, scalar_prefetch = 0 : i64, scratch_operands = 1 : i64, tpu.core_type = #tpu.core_type<tc>, window_params = [{transform_indices = @transform_0, window_bounds = array<i64: 8, 128>}, {transform_indices = @transform_1, window_bounds = array<i64: 128, 128>}, {transform_indices = @transform_2, window_bounds = array<i64: 1, 128>}, {transform_indices = @transform_3, window_bounds = array<i64: 8, 128>}]} {
    %c0_i32 = arith.constant 0 : i32
    %0 = arith.cmpi eq, %arg2, %c0_i32 : i32
    %1 = arith.extui %0 : i1 to i32
    %c0_i32_0 = arith.constant 0 : i32
    %2 = arith.cmpi ne, %1, %c0_i32_0 : i32
    scf.if %2 {
      %cst_10 = arith.constant 0.000000e+00 : f32
      %12 = vector.broadcast %cst_10 : f32 to vector<8x128xf32>
      %c0_11 = arith.constant 0 : index
      %c0_12 = arith.constant 0 : index
      %13 = vector.load %arg7[%c0_11, %c0_12] : memref<8x128xf32, #tpu.memory_space<vmem>>, vector<8x128xf32>
      tpu.vector_store %arg7[%c0_11, %c0_12], %12 {strides = array<i32>} : memref<8x128xf32, #tpu.memory_space<vmem>>, vector<8x128xf32>,
    } else {
    }
    %c0 = arith.constant 0 : index
    %c0_1 = arith.constant 0 : index
    %3 = vector.load %arg7[%c0, %c0_1] : memref<8x128xf32, #tpu.memory_space<vmem>>, vector<8x128xf32>
    %c0_2 = arith.constant 0 : index
    %c0_3 = arith.constant 0 : index
    %4 = vector.load %arg3[%c0_2, %c0_3] : memref<8x128xf32, #tpu.memory_space<vmem>>, vector<8x128xf32>
    %c0_4 = arith.constant 0 : index
    %c0_5 = arith.constant 0 : index
    %5 = vector.load %arg4[%c0_4, %c0_5] : memref<128x128xf32, #tpu.memory_space<vmem>>, vector<128x128xf32>
    %cst = arith.constant dense<0.000000e+00> : vector<8x128xf32>
    %6 = tpu.matmul %4, %5, %cst {dimension_numbers = #tpu.dot_dimension_numbers<[1], [0], [0], [1], [0, 0, 1, 1], [], []>} : vector<8x128xf32>, vector<128x128xf32>, vector<8x128xf32> -> vector<8x128xf32>
    %7 = arith.addf %3, %6 : vector<8x128xf32>
    %c0_6 = arith.constant 0 : index
    %c0_7 = arith.constant 0 : index
    %8 = vector.load %arg7[%c0_6, %c0_7] : memref<8x128xf32, #tpu.memory_space<vmem>>, vector<8x128xf32>
    tpu.vector_store %arg7[%c0_6, %c0_7], %7 {strides = array<i32>} : memref<8x128xf32, #tpu.memory_space<vmem>>, vector<8x128xf32>,
    %c0_i32_8 = arith.constant 0 : i32
    %9 = arith.cmpi eq, %arg2, %c0_i32_8 : i32
    %10 = arith.extui %9 : i1 to i32
    %c0_i32_9 = arith.constant 0 : i32
    %11 = arith.cmpi ne, %10, %c0_i32_9 : i32
    scf.if %11 {
      %c0_10 = arith.constant 0 : index
      %c0_11 = arith.constant 0 : index
      %12 = vector.load %arg7[%c0_10, %c0_11] : memref<8x128xf32, #tpu.memory_space<vmem>>, vector<8x128xf32>
      %c0_12 = arith.constant 0 : index
      %c0_13 = arith.constant 0 : index
      %13 = vector.load %arg5[%c0_12, %c0_13] : memref<1x128xf32, #tpu.memory_space<vmem>>, vector<1x128xf32>
      %14 = vector.broadcast %13 : vector<1x128xf32> to vector<8x128xf32>
      %15 = arith.addf %12, %14 : vector<8x128xf32>
      %c0_14 = arith.constant 0 : index
      %c0_15 = arith.constant 0 : index
      %16 = vector.load %arg6[%c0_14, %c0_15] : memref<8x128xf32, #tpu.memory_space<vmem>>, vector<8x128xf32>
      tpu.vector_store %arg6[%c0_14, %c0_15], %15 {strides = array<i32>} : memref<8x128xf32, #tpu.memory_space<vmem>>, vector<8x128xf32>,
    } else {
    }
    return
  }
  func.func @transform_0(%arg0: i32, %arg1: i32, %arg2: i32) -> (i32, i32) {
    %c0_i32 = arith.constant 0 : i32
    return %arg0, %arg2 : i32, i32
  }
  func.func @transform_1(%arg0: i32, %arg1: i32, %arg2: i32) -> (i32, i32) {
    %c0_i32 = arith.constant 0 : i32
    return %arg2, %arg1 : i32, i32
  }
  func.func @transform_2(%arg0: i32, %arg1: i32, %arg2: i32) -> (i32, i32) {
    %c0_i32 = arith.constant 0 : i32
    %c0_i32_0 = arith.constant 0 : i32
    return %c0_i32, %arg1 : i32, i32
  }
  func.func @transform_3(%arg0: i32, %arg1: i32, %arg2: i32) -> (i32, i32) {
    %c0_i32 = arith.constant 0 : i32
    return %arg0, %arg1 : i32, i32
  }
}

</mosaic_0001>

<bundles_post_ra>
// kernel: lr_forward.1
= control target key start
LH: loop header
LB: loop body
LE: loop exit
PB: predicated region body
PF: predicated region fallthrough
CT: control target
= control target key end

     0   :  { %v215_v1 = vmov 0.0   ;;  %vm216_vm0 = vmmov 0   ;;  %s295_s0 = inlined_call_operand.vmem [shape: f32[8,128], index: 0, kind: input, shape index: {}]   ;;  %s296_s1 = inlined_call_operand.vmem [shape: f32[128,128], index: 1, kind: input, shape index: {}]   ;;  %s297_s2 = inlined_call_operand.vmem [shape: f32[1,128], index: 2, kind: input, shape index: {}]   ;;  %s298_s3 = inlined_call_operand.hbm [shape: f32[8,128], index: 3, kind: output, shape index: {}]  }
   0x1   :  { %v37_v0 = vld [vmem:[%s296_s1 + $0x78] sm:$0xff]  ;;  %155 = vmatprep.subr.mxu0 %v215_v1  ;;  %v36_v2 = vld [vmem:[%s296_s1 + $0x70] sm:$0xff]  ;;  %187 = vmatprep.mubr.msk.f32.mxu0 %vm216_vm0, %v215_v1  ;;  %v35_v3 = vld [vmem:[%s296_s1 + $0x68] sm:$0xff] }
   0x2   :  { %156 = vmatpush3.msra.mxu0 %v37_v0  ;;  %v34_v4 = vld [vmem:[%s296_s1 + $0x60] sm:$0xff] }
   0x3   :  { %157 = vmatprep.subr.mxu0 %v215_v1 }
   0x4   :  { %158 = vmatpush3.msra.mxu0 %v36_v2 }
   0x5   :  { %159 = vmatprep.subr.mxu0 %v215_v1 }
   0x6   :  { %8 = vsyncpa [#allocation4], 0  ;;  %160 = vmatpush3.msra.mxu0 %v35_v3  ;;  %v33_v5 = vld [vmem:[%s296_s1 + $0x58] sm:$0xff]  ;;  %v32_v6 = vld [vmem:[%s296_s1 + $0x50] sm:$0xff]  ;;  %s217_s21 = smov [#allocation3]  }
   0x7   :  { %161 = vmatprep.subr.mxu0 %v215_v1  ;;  %v31_v7 = vld [vmem:[%s296_s1 + $0x48] sm:$0xff]  ;;  %v30_v8 = vld [vmem:[%s296_s1 + $0x40] sm:$0xff]  ;;  %v29_v9 = vld [vmem:[%s296_s1 + $0x38] sm:$0xff]  ;;  %s129_s22 = sshll.u32 %s217_s21, 4  ;;  %s130_s22 = int_to_ptr.vmem [resolvable:$true] %s129_s22 }
   0x8   :  { %162 = vmatpush3.msra.mxu0 %v34_v4  ;;  %v28_v10 = vld [vmem:[%s296_s1 + $0x30] sm:$0xff]  ;;  %v27_v11 = vld [vmem:[%s296_s1 + $0x28] sm:$0xff]  ;;  %v26_v12 = vld [vmem:[%s296_s1 + $0x20] sm:$0xff]  ;;  %p198_p1 = scmp.lt.s32.totalorder %s130_s22, %s130_s22 }
   0x9   :  { %163 = vmatprep.subr.mxu0 %v215_v1  ;;  %v25_v13 = vld [vmem:[%s296_s1 + $0x18] sm:$0xff]  ;;  %v24_v14 = vld [vmem:[%s296_s1 + $0x10] sm:$0xff]  ;;  %v23_v15 = vld [vmem:[%s296_s1 + $0x8] sm:$0xff] }
   0xa   :  { %164 = vmatpush3.msra.mxu0 %v33_v5  ;;  %v22_v16 = vld [vmem:[%s296_s1] sm:$0xff]  ;;  %s193_s1 = scalar_lea.vmem %s130_s22, 128 }
   0xb   :  { %165 = vmatprep.subr.mxu0 %v215_v1  ;;  %v21_v17 = vld [vmem:[%s295_s0] sm:$0xff]  ;;  %p194_p0 = scmp.ne.s32.totalorder %s130_s22, %s193_s1  ;;  %p199_p2 = scmp.lt.s32.totalorder %s193_s1, %s193_s1 }
   0xc   :  { %166 = vmatpush3.msra.mxu0 %v32_v6  ;;  %v137_v18 = vld [vmem:[%s297_s2] ss:$0 sm:$0xff] }
   0xd   :  { %167 = vmatprep.subr.mxu0 %v215_v1  ;;  %p200_p3 = por %p199_p2, %p198_p1 }
   0xe   :  { %168 = vmatpush3.msra.mxu0 %v31_v7 }
   0xf   :  { %169 = vmatprep.subr.mxu0 %v215_v1  ;;  %p201_p4 = pnand %p200_p3, %p194_p0 }
  0x10   :  { %170 = vmatpush3.msra.mxu0 %v30_v8 }
  0x11   :  { %171 = vmatprep.subr.mxu0 %v215_v1 }
  0x12   :  { %172 = vmatpush3.msra.mxu0 %v29_v9 }
  0x13   :  { %173 = vmatprep.subr.mxu0 %v215_v1 }
  0x14   :  { %174 = vmatpush3.msra.mxu0 %v28_v10 }
  0x15   :  { %175 = vmatprep.subr.mxu0 %v215_v1 }
  0x16   :  { %176 = vmatpush3.msra.mxu0 %v27_v11 }
  0x17   :  { %177 = vmatprep.subr.mxu0 %v215_v1 }
  0x18   :  { %178 = vmatpush3.msra.mxu0 %v26_v12 }
  0x19   :  { %179 = vmatprep.subr.mxu0 %v215_v1 }
  0x1a   :  { %180 = vmatpush3.msra.mxu0 %v25_v13 }
  0x1b   :  { %181 = vmatprep.subr.mxu0 %v215_v1 }
  0x1c   :  { %182 = vmatpush3.msra.mxu0 %v24_v14 }
  0x1d   :  { %183 = vmatprep.subr.mxu0 %v215_v1 }
  0x1e   :  { %184 = vmatpush3.msra.mxu0 %v23_v15 }
  0x1f   :  { %185 = vmatprep.subr.mxu0 %v215_v1 }
  0x20   :  { %186 = vmatpush3.msra.mxu0 %v22_v16 }
  0x21   :  { %188 = vmatmul.mubr.f32.vlgmr.msra.gmra.mxu0 %v21_v17 }
  0xe1   :  { %v104_v19 = vpop.f32.mrf.mxu0 }
  0xe2   :  { %v121_v20 = vadd.f32 %v137_v18, %v104_v19 }
  0xe3   :  { %v189_v21 = vpop.f32.mrf.mxu0 }
  0xe4   :  { %122 = vst [vmem:[#allocation3] sm:$0xff] %v121_v20 }
  0xe5   :  { %204 = shalt.err (!%p201_p4)
}
  0xe6   :  { %132 = dma.vmem_to_hbm [thread:$0]  %s130_s22, 128, %s298_s3, [#allocation4]  }
  0xe7   :  { %213 = dma.done.wait [#allocation4], 128  }
  0xe8   :  { %214 = vsyncadd [#allocation4], 4294967168 }
  0xe9   :  { %136 = vsyncpa [#allocation4], 1 }

</bundles_post_ra>
